<compile_context>
chip_gen: v7x
topology: tpu7x:2x2x1
jax: 0.10.0
libtpu: 0.0.40
codegen_flags: <defaults>
</compile_context>

<pallas_src>
import jax
import jax.numpy as jnp
from jax.experimental import pallas as pl
from jax.experimental.pallas import tpu as pltpu


def latent_sampler_kernel(x_ref, w_ref, b_ref, eps_ref, ml_ref, z_ref):
    """One batch tile: fused projection + reparameterize.

    x_ref   : (TB, D_in)       f32 or bf16
    w_ref   : (D_in, 2*D_lat)  f32 or bf16   [ W_mean.T | W_logvar.T ]  (resident)
    b_ref   : (1, 2*D_lat)     f32           [ b_mean   | b_logvar   ]  (resident)
    eps_ref : (TB, D_lat)      f32           pre-sampled standard normal
    ml_ref  : (TB, 2*D_lat)    f32           output [ mean | log_var ]
    z_ref   : (TB, D_lat)      f32           output z
    """
    d_lat = z_ref.shape[-1]

    # Single fused MXU matmul for both projections; f32 accumulation.
    fused = jnp.dot(x_ref[...], w_ref[...], preferred_element_type=jnp.float32)
    fused = fused + b_ref[...].astype(jnp.float32)

    # Direct lane-dense store of the fused [mean | log_var] slab (no copy).
    ml_ref[...] = fused.astype(ml_ref.dtype)

    mean = fused[:, :d_lat]
    log_var = fused[:, d_lat:]
    std = jnp.exp(0.5 * log_var)                      # single EUP exp
    z_ref[...] = (mean + eps_ref[...].astype(jnp.float32) * std).astype(z_ref.dtype)


def make_fused_params(w_mean_t, b_mean, w_logvar_t, b_logvar,
                      *, use_bf16_matmul=False):
    """One-time parameter setup: pack both projections lane-contiguously.

    Call once (not per forward) -- avoids paying a weight-sized HBM
    write+read on every call.
    """
    d_lat = w_mean_t.shape[1]
    w_fused = jnp.concatenate([w_mean_t, w_logvar_t], axis=1)      # (D_in, 2*D_lat)
    b_fused = jnp.concatenate([jnp.reshape(b_mean, (1, d_lat)),
                               jnp.reshape(b_logvar, (1, d_lat))],
                              axis=1).astype(jnp.float32)          # (1, 2*D_lat)
    if use_bf16_matmul:
        w_fused = w_fused.astype(jnp.bfloat16)                     # cast once, stream bf16
    return w_fused, b_fused


def _pick_batch_tile(batch, d_in, d_lat, *, act_bytes=4,
                     vmem_budget_bytes=24 << 20, max_tile=1024, round_to=8):
    """Batch tile from an explicit VMEM budget for the streamed tiles.

    Accounts for double-buffered x / eps / [mean|log_var] / z tiles; the
    weight is single-buffered (Buffered(1)) and handled separately.
    """
    per_row = 2 * act_bytes * (d_in + d_lat) + 2 * 4 * (2 * d_lat + d_lat)
    cap = max(round_to, min(max_tile, vmem_budget_bytes // max(per_row, 1)))
    if batch >= 2 * round_to:
        cap = min(cap, batch // 2)        # >= 2 grid blocks -> both v7x TCs busy
    cap = max(round_to, (cap // round_to) * round_to)
    if batch <= cap:
        return batch
    for tb in range(cap, round_to - 1, -round_to):
        if batch % tb == 0:
            return tb
    # TODO(synk): no multiple-of-`round_to` divisor <= cap (prime-ish B);
    # fall back to the full batch (accepting the VMEM risk).
    return batch


def latent_sampler_pallas(encoder_output, w_fused, b_fused, epsilon,
                          *, use_bf16_matmul=False, batch_tile=None):
    """LatentSampler forward + KL loss (Ms2z's kl_divergence_loss).

    encoder_output : (B, D_in)        f32
    w_fused        : (D_in, 2*D_lat)  f32 or bf16  (from make_fused_params)
    b_fused        : (1, 2*D_lat)     f32
    epsilon        : (B, D_lat)       f32

    Returns (z, mean, log_var, kl_loss); kl_loss is scalar, normalized by B.
    """
    B, D_in = encoder_output.shape
    D_lat = w_fused.shape[1] // 2

    if use_bf16_matmul:
        encoder_output = encoder_output.astype(jnp.bfloat16)
        round_to = 16                     # bf16 sublane packing
    else:
        round_to = 8
    act_bytes = jnp.dtype(encoder_output.dtype).itemsize

    TB = batch_tile if batch_tile is not None else _pick_batch_tile(
        B, D_in, D_lat, act_bytes=act_bytes, round_to=round_to)
    assert B % TB == 0, "batch tile must divide batch"
    grid = (B // TB,)

    # VMEM budget: double-buffered streamed tiles + single-buffered weight/bias.
    w_bytes = w_fused.size * jnp.dtype(w_fused.dtype).itemsize
    est_bytes = (2 * TB * (act_bytes * D_in + 4 * D_lat + 4 * 2 * D_lat + 4 * D_lat)
                 + w_bytes + b_fused.size * 4)
    vmem_limit = int(min(56 << 20, max(32 << 20, 2 * est_bytes)))

    ml, z = pl.pallas_call(
        latent_sampler_kernel,
        out_shape=(jax.ShapeDtypeStruct((B, 2 * D_lat), jnp.float32),
                   jax.ShapeDtypeStruct((B, D_lat), jnp.float32)),
        grid=grid,
        in_specs=[
            pl.BlockSpec((TB, D_in), lambda i: (i, 0)),                 # x tile
            pl.BlockSpec((D_in, 2 * D_lat), lambda i: (0, 0),
                         pipeline_mode=pl.Buffered(1)),                 # resident weight
            pl.BlockSpec((1, 2 * D_lat), lambda i: (0, 0),
                         pipeline_mode=pl.Buffered(1)),                 # resident bias
            pl.BlockSpec((TB, D_lat), lambda i: (i, 0)),                # epsilon tile
        ],
        out_specs=(
            pl.BlockSpec((TB, 2 * D_lat), lambda i: (i, 0)),            # [mean|log_var]
            pl.BlockSpec((TB, D_lat), lambda i: (i, 0)),                # z
        ),
        compiler_params=pltpu.CompilerParams(
            dimension_semantics=("parallel",),                          # megacore on v7x
            vmem_limit_bytes=vmem_limit),
    )(encoder_output, w_fused, b_fused, epsilon)

    mean = ml[:, :D_lat]
    log_var = ml[:, D_lat:]
    # KL finished in JAX (negligible elementwise work; keeps the kernel's
    # output lane-dense with no extra column / masked store).
    kl = -0.5 * jnp.sum(1.0 + log_var - mean * mean - jnp.exp(log_var)) / B
    return z, mean, log_var, kl


def init_linear_params(key, in_dim, out_dim):
    """Deterministic init matching nn.Linear's U(-1/sqrt(in), 1/sqrt(in))."""
    kw, kb = jax.random.split(key)
    bound = 1.0 / jnp.sqrt(jnp.float32(in_dim))
    w_t = jax.random.uniform(kw, (in_dim, out_dim), jnp.float32, -bound, bound)
    b = jax.random.uniform(kb, (1, out_dim), jnp.float32, -bound, bound)
    return w_t, b


if __name__ == "__main__":
    # Small shapes consistent with Ms2z: encoder_h_size == node_dim == 32,
    # latent_dim == 32, batch == 8.
    batch = 8
    input_dim = 32      # node_dim / encoder_h_size
    latent_dim = 32

    key = jax.random.PRNGKey(0)
    k_x, k_m, k_v, k_eps = jax.random.split(key, 4)

    encoder_output = jax.random.normal(k_x, (batch, input_dim), jnp.float32)
    w_mean_t, b_mean = init_linear_params(k_m, input_dim, latent_dim)
    w_logvar_t, b_logvar = init_linear_params(k_v, input_dim, latent_dim)
    epsilon = jax.random.normal(k_eps, (batch, latent_dim), jnp.float32)

    # One-time parameter packing (hoisted out of the forward call).
    w_fused, b_fused = make_fused_params(w_mean_t, b_mean, w_logvar_t, b_logvar,
                                         use_bf16_matmul=False)

    z, mean, log_var, kl = latent_sampler_pallas(
        encoder_output, w_fused, b_fused, epsilon, use_bf16_matmul=False)
    jax.block_until_ready((z, mean, log_var, kl))

    # Pure-JAX reference check.
    mean_ref = encoder_output @ w_mean_t + b_mean
    logvar_ref = encoder_output @ w_logvar_t + b_logvar
    z_ref = mean_ref + epsilon * jnp.exp(0.5 * logvar_ref)
    kl_ref = (-0.5 * jnp.sum(1.0 + logvar_ref - mean_ref ** 2
                             - jnp.exp(logvar_ref)) / batch)

    assert jnp.allclose(mean, mean_ref, atol=1e-5, rtol=1e-5)
    assert jnp.allclose(log_var, logvar_ref, atol=1e-5, rtol=1e-5)
    assert jnp.allclose(z, z_ref, atol=1e-5, rtol=1e-5)
    assert jnp.allclose(kl, kl_ref, atol=1e-4, rtol=1e-4)

    print("KERNEL_OK")
</pallas_src>

<mosaic_0001>
module attributes {stable_mosaic.version = 11 : i64} {
  func.func @latent_sampler_kernel(%arg0: i32, %arg1: memref<8x32xf32, #tpu.memory_space<vmem>>, %arg2: memref<32x64xf32, #tpu.memory_space<vmem>>, %arg3: memref<1x64xf32, #tpu.memory_space<vmem>>, %arg4: memref<8x32xf32, #tpu.memory_space<vmem>>, %arg5: memref<8x64xf32, #tpu.memory_space<vmem>>, %arg6: memref<8x32xf32, #tpu.memory_space<vmem>>) attributes {dimension_semantics = [#tpu.dimension_semantics<parallel>], iteration_bounds = array<i64: 1>, scalar_prefetch = 0 : i64, scratch_operands = 0 : i64, tpu.core_type = #tpu.core_type<tc>, window_params = [{transform_indices = @transform_0, window_bounds = array<i64: 8, 32>}, {pipeline_mode = #tpu.pipeline_mode<synchronous>, transform_indices = @transform_1, window_bounds = array<i64: 32, 64>}, {pipeline_mode = #tpu.pipeline_mode<synchronous>, transform_indices = @transform_2, window_bounds = array<i64: 1, 64>}, {transform_indices = @transform_3, window_bounds = array<i64: 8, 32>}, {transform_indices = @transform_4, window_bounds = array<i64: 8, 64>}, {transform_indices = @transform_5, window_bounds = array<i64: 8, 32>}]} {
    %c0 = arith.constant 0 : index
    %c0_0 = arith.constant 0 : index
    %0 = vector.load %arg1[%c0, %c0_0] : memref<8x32xf32, #tpu.memory_space<vmem>>, vector<8x32xf32>
    %c0_1 = arith.constant 0 : index
    %c0_2 = arith.constant 0 : index
    %1 = vector.load %arg2[%c0_1, %c0_2] : memref<32x64xf32, #tpu.memory_space<vmem>>, vector<32x64xf32>
    %cst = arith.constant dense<0.000000e+00> : vector<8x64xf32>
    %2 = tpu.matmul %0, %1, %cst {dimension_numbers = #tpu.dot_dimension_numbers<[1], [0], [0], [1], [0, 0, 1, 1], [], []>} : vector<8x32xf32>, vector<32x64xf32>, vector<8x64xf32> -> vector<8x64xf32>
    %c0_3 = arith.constant 0 : index
    %c0_4 = arith.constant 0 : index
    %3 = vector.load %arg3[%c0_3, %c0_4] : memref<1x64xf32, #tpu.memory_space<vmem>>, vector<1x64xf32>
    %4 = vector.broadcast %3 : vector<1x64xf32> to vector<8x64xf32>
    %5 = arith.addf %2, %4 : vector<8x64xf32>
    %c0_5 = arith.constant 0 : index
    %c0_6 = arith.constant 0 : index
    %6 = vector.load %arg5[%c0_5, %c0_6] : memref<8x64xf32, #tpu.memory_space<vmem>>, vector<8x64xf32>
    tpu.vector_store %arg5[%c0_5, %c0_6], %5 {strides = array<i32>} : memref<8x64xf32, #tpu.memory_space<vmem>>, vector<8x64xf32>,
    %7 = vector.extract_strided_slice %5 {offsets = [0, 0], sizes = [8, 32], strides = [1, 1]} : vector<8x64xf32> to vector<8x32xf32>
    %8 = vector.extract_strided_slice %5 {offsets = [0, 32], sizes = [8, 32], strides = [1, 1]} : vector<8x64xf32> to vector<8x32xf32>
    %cst_7 = arith.constant 5.000000e-01 : f32
    %9 = vector.broadcast %cst_7 : f32 to vector<8x32xf32>
    %10 = arith.mulf %9, %8 : vector<8x32xf32>
    %11 = math.exp %10 : vector<8x32xf32>
    %c0_8 = arith.constant 0 : index
    %c0_9 = arith.constant 0 : index
    %12 = vector.load %arg4[%c0_8, %c0_9] : memref<8x32xf32, #tpu.memory_space<vmem>>, vector<8x32xf32>
    %13 = arith.mulf %12, %11 : vector<8x32xf32>
    %14 = arith.addf %7, %13 : vector<8x32xf32>
    %c0_10 = arith.constant 0 : index
    %c0_11 = arith.constant 0 : index
    %15 = vector.load %arg6[%c0_10, %c0_11] : memref<8x32xf32, #tpu.memory_space<vmem>>, vector<8x32xf32>
    tpu.vector_store %arg6[%c0_10, %c0_11], %14 {strides = array<i32>} : memref<8x32xf32, #tpu.memory_space<vmem>>, vector<8x32xf32>,
    return
  }
  func.func @transform_0(%arg0: i32) -> (i32, i32) {
    %c0_i32 = arith.constant 0 : i32
    %c0_i32_0 = arith.constant 0 : i32
    return %arg0, %c0_i32 : i32, i32
  }
  func.func @transform_1(%arg0: i32) -> (i32, i32) {
    %c0_i32 = arith.constant 0 : i32
    %c0_i32_0 = arith.constant 0 : i32
    %c0_i32_1 = arith.constant 0 : i32
    return %c0_i32, %c0_i32_0 : i32, i32
  }
  func.func @transform_2(%arg0: i32) -> (i32, i32) {
    %c0_i32 = arith.constant 0 : i32
    %c0_i32_0 = arith.constant 0 : i32
    %c0_i32_1 = arith.constant 0 : i32
    return %c0_i32, %c0_i32_0 : i32, i32
  }
  func.func @transform_3(%arg0: i32) -> (i32, i32) {
    %c0_i32 = arith.constant 0 : i32
    %c0_i32_0 = arith.constant 0 : i32
    return %arg0, %c0_i32 : i32, i32
  }
  func.func @transform_4(%arg0: i32) -> (i32, i32) {
    %c0_i32 = arith.constant 0 : i32
    %c0_i32_0 = arith.constant 0 : i32
    return %arg0, %c0_i32 : i32, i32
  }
  func.func @transform_5(%arg0: i32) -> (i32, i32) {
    %c0_i32 = arith.constant 0 : i32
    %c0_i32_0 = arith.constant 0 : i32
    return %arg0, %c0_i32 : i32, i32
  }
}

</mosaic_0001>

<bundles_post_ra>
// kernel: tpu_custom_call.1
= control target key start
LH: loop header
LB: loop body
LE: loop exit
PB: predicated region body
PF: predicated region fallthrough
CT: control target
= control target key end

     0   :  { %11 = vsyncpa [#allocation3], 0  ;;  %s411_s0 = inlined_call_operand.hbm [shape: f32[8,32], index: 0, kind: input, shape index: {}]   ;;  %s412_s1 = inlined_call_operand.hbm [shape: f32[32,64], index: 1, kind: input, shape index: {}]   ;;  %s413_s2 = inlined_call_operand.vmem [shape: f32[1,64], index: 2, kind: input, shape index: {}]   ;;  %s414_s3 = inlined_call_operand.vmem [shape: f32[8,32], index: 3, kind: input, shape index: {}]   ;;  %s415_s4 = inlined_call_operand.hbm [shape: f32[8,64], index: 4, kind: output, shape index: {0}]   ;;  %s416_s5 = inlined_call_operand.hbm [shape: f32[8,32], index: 5, kind: output, shape index: {1}]  }
   0x1   :  { %12 = vsyncpa [#allocation6], 0 }
   0x2   :  { %13 = vsyncpa [#allocation4], 0 }
   0x3   :  { %14 = vsyncpa [#allocation9], 0  ;;  %s308_s18 = smov [#allocation2]   ;;  %s309_s20 = smov [#allocation5]  }
   0x4   :  { %s21_s19 = sshll.u32 %s308_s18, 4  ;;  %s30_s21 = sshll.u32 %s309_s20, 4  ;;  %s22_s19 = int_to_ptr.vmem [resolvable:$true] %s21_s19  ;;  %s348_s21 = int_to_ptr.vmem [resolvable:$true] %s30_s21 }
   0x5   :  { %s212_s24 = scalar_lea.hbm %s411_s0, 128 }
   0x6   :  { %p213_p0 = scmp.ne.s32.totalorder %s411_s0, %s212_s24  ;;  %p216_p1 = scmp.lt.u32.totalorder %s212_s24, %s411_s0 }
   0x8   :  { %p218_p2 = pnand %p216_p1, %p213_p0 }
   0xa   :  { %221 = shalt.err (!%p218_p2)
}
   0xb   :  { %s222_s29 = scalar_lea.vmem %s22_s19, 128  ;;  %p227_p4 = scmp.lt.s32.totalorder %s22_s19, %s22_s19 }
   0xc   :  { %p223_p3 = scmp.ne.s32.totalorder %s22_s19, %s222_s29  ;;  %p228_p5 = scmp.lt.s32.totalorder %s222_s29, %s222_s29 }
   0xe   :  { %p229_p6 = por %p228_p5, %p227_p4 }
  0x10   :  { %p230_p7 = pnand %p229_p6, %p223_p3 }
  0x12   :  { %233 = shalt.err (!%p230_p7)
}
  0x13   :  { %24 = dma.hbm_to_vmem [thread:$0]  %s411_s0, 128, %s22_s19, [#allocation3]  }
  0x14   :  { %s234_s9 = scalar_lea.hbm %s412_s1, 512 }
  0x15   :  { %p235_p8 = scmp.ne.s32.totalorder %s412_s1, %s234_s9  ;;  %p238_p9 = scmp.lt.u32.totalorder %s234_s9, %s412_s1 }
  0x17   :  { %p240_p10 = pnand %p238_p9, %p235_p8 }
  0x19   :  { %243 = shalt.err (!%p240_p10)
}
  0x1a   :  { %s244_s14 = scalar_lea.vmem %s348_s21, 512  ;;  %p249_p12 = scmp.lt.s32.totalorder %s348_s21, %s348_s21 }
  0x1b   :  { %p245_p11 = scmp.ne.s32.totalorder %s348_s21, %s244_s14  ;;  %p250_p13 = scmp.lt.s32.totalorder %s244_s14, %s244_s14 }
  0x1d   :  { %p251_p0 = por %p250_p13, %p249_p12 }
  0x1f   :  { %p252_p1 = pnand %p251_p0, %p245_p11 }
  0x21   :  { %255 = shalt.err (!%p252_p1)
}
  0x22   :  { %s310_s0 = smov 128   ;;  %s311_s15 = smov 8  }
  0x23   :  { %36 = dma.hbm_to_vmem [thread:$0]  %s412_s1, 512, %s348_s21, [#allocation6], %s310_s0, %s310_s0, %s311_s15  }
  0x24   :  { %300 = dma.done.wait [#allocation3], 128  }
  0x25   :  { %301 = vsyncadd [#allocation3], 4294967168 }
  0x26   :  { %302 = dma.done.wait [#allocation6], 512  }
  0x27   :  { %303 = vsyncadd [#allocation6], 4294966784  ;;  %v312_v0 = vmov 0.0|0.0   ;;  %vm313_vm0 = vmmov 0   ;;  %v314_v1 = vmov 0.0   ;;  %v48_v2 = vld [vmem:[#allocation5] sm:$0xff] }
  0x28   :  { %194 = vmatprep.subr.bf16.mxu0 %v312_v0  ;;  %191 = vmatprep.mubr.msk.f32.mxu0 %vm313_vm0, %v314_v1  ;;  %v49_v3 = vld [vmem:[#allocation5 + $0x8] sm:$0xff]  ;;  %v50_v4 = vld [vmem:[#allocation5 + $0x10] sm:$0xff]  ;;  %v51_v6 = vld [vmem:[#allocation5 + $0x18] sm:$0xff]  ;;  %vm59_vm1 = vcmask 261120   ;;  %vm133_vm2 = vcmask 523264   ;;  %s315_s19 = smov [#allocation7]  }
  0x29   :  { %v195_v5 = vpack.c.bf16 %v49_v3, %v48_v2  ;;  %v198_v7 = vpack.c.bf16 %v51_v6, %v50_v4  ;;  %v47_v8 = vld [vmem:[#allocation2] sm:$0xff]  ;;  %s152_s20 = sshll.u32 %s315_s19, 4  ;;  %s153_s20 = int_to_ptr.vmem [resolvable:$true] %s152_s20 }
  0x2a   :  { %v176_v9 = vld [vmem:[%s413_s2] ss:$0 sm:$0xff]  ;;  %s256_s21 = scalar_lea.vmem %s153_s20, 128  ;;  %p261_p3 = scmp.lt.s32.totalorder %s153_s20, %s153_s20 }
  0x2b   :  { %196 = vmatpush3.bf16.msra.mxu0 %v195_v5  ;;  %p257_p2 = scmp.ne.s32.totalorder %s153_s20, %s256_s21  ;;  %p262_p4 = scmp.lt.s32.totalorder %s256_s21, %s256_s21 }
  0x2c   :  { %197 = vmatprep.subr.bf16.mxu0 %v312_v0 }
  0x2d   :  { %p263_p5 = por %p262_p4, %p261_p3 }
  0x2f   :  { %199 = vmatpush3.bf16.msra.mxu0 %v198_v7  ;;  %p264_p6 = pnand %p263_p5, %p257_p2 }
  0x32   :  { %192 = vmatmul.mubr.msk.f32.vlgmr.msra.gmra.mrb[0].mxu0 %vm59_vm1, %v47_v8 }
 0x105   :  { %v129_v10 = vpop.f32.mrb[0].mxu0 }
 0x106   :  { %v130_v11 = vadd.f32 %v176_v9, %v129_v10  ;;  %v193_v12 = vpop.f32.mrb[1].mxu0 }
 0x108   :  { %v135_v13 = vmul.f32 0.5, %v130_v11  ;;  %134 = vst.msk [vmem:[#allocation7] sm:$0xff] %vm133_vm2, %v130_v11 }
 0x10a   :  { %v136_v14 = vmul.f32 1.442695, %v135_v13 }
 0x10c   :  { %210 = vpow2.f32 %v136_v14 }
 0x10d   :  { %267 = shalt.err (!%p264_p6)
}
 0x10e   :  { %s268_s23 = scalar_lea.hbm %s415_s4, 128 }
 0x10f   :  { %p269_p7 = scmp.ne.s32.totalorder %s415_s4, %s268_s23  ;;  %p272_p8 = scmp.lt.u32.totalorder %s268_s23, %s415_s4 }
 0x111   :  { %p274_p9 = pnand %p272_p8, %p269_p7 }
 0x113   :  { %277 = shalt.err (!%p274_p9)
}
 0x114   :  { %155 = dma.vmem_to_hbm [thread:$0]  %s153_s20, 128, %s415_s4, [#allocation4]   ;;  %v138_v16 = vld [vmem:[%s414_s3] sm:$0xff] }
 0x115   :  { %s316_s30 = smov 96   ;;  %s317_s8 = smov [#allocation8]  }
 0x116   :  { %v211_v15 = vpop.eup %210  ;;  %s162_s9 = sshll.u32 %s317_s8, 4  ;;  %s163_s9 = int_to_ptr.vmem [resolvable:$true] %s162_s9 }
 0x117   :  { %140 = vrot.lane.b32.xlu0 %v211_v15, %s316_s30  ;;  %s278_s10 = scalar_lea.vmem %s163_s9, 128  ;;  %p283_p11 = scmp.lt.s32.totalorder %s163_s9, %s163_s9 }
 0x118   :  { %p279_p10 = scmp.ne.s32.totalorder %s163_s9, %s278_s10  ;;  %p284_p12 = scmp.lt.s32.totalorder %s278_s10, %s278_s10 }
 0x11a   :  { %p285_p13 = por %p284_p12, %p283_p11 }
 0x11c   :  { %p286_p0 = pnand %p285_p13, %p279_p10 }
 0x189   :  { %v141_v17 = vpop.permute.xlu0 %140 }
 0x18a   :  { %v143_v18 = vmul.f32 %v141_v17, %v138_v16 }
 0x18c   :  { %v144_v19 = vadd.f32 %v143_v18, %v130_v11 }
 0x18e   :  { %145 = vst.msk [vmem:[#allocation8] sm:$0xff] %vm59_vm1, %v144_v19 }
 0x18f   :  { %289 = shalt.err (!%p286_p0)
}
 0x190   :  { %s290_s12 = scalar_lea.hbm %s416_s5, 128 }
 0x191   :  { %p291_p1 = scmp.ne.s32.totalorder %s416_s5, %s290_s12  ;;  %p294_p2 = scmp.lt.u32.totalorder %s290_s12, %s416_s5 }
 0x193   :  { %p296_p3 = pnand %p294_p2, %p291_p1 }
 0x195   :  { %299 = shalt.err (!%p296_p3)
}
 0x196   :  { %165 = dma.vmem_to_hbm [thread:$0]  %s163_s9, 128, %s416_s5, [#allocation9]  }
 0x197   :  { %304 = dma.done.wait [#allocation4], 128  }
 0x198   :  { %305 = vsyncadd [#allocation4], 4294967168 }
 0x199   :  { %306 = dma.done.wait [#allocation9], 128  }
 0x19a   :  { %307 = vsyncadd [#allocation9], 4294967168 }
 0x19b   :  { %172 = vsyncpa [#allocation3], 1 }
 0x19c   :  { %173 = vsyncpa [#allocation6], 1 }
 0x19d   :  { %174 = vsyncpa [#allocation4], 1 }
 0x19e   :  { %175 = vsyncpa [#allocation9], 1 }

</bundles_post_ra>
